<compile_context>
chip_gen: v7x
topology: tpu7x:2x2x1
jax: 0.10.0
libtpu: 0.0.40
codegen_flags: <defaults>
</compile_context>

<pallas_src>
import functools

import jax
import jax.numpy as jnp
from jax.experimental import pallas as pl
from jax.experimental.pallas import tpu as pltpu


def _round_up(x: int, m: int) -> int:
    return ((x + m - 1) // m) * m


def _pad2d(a, rows: int, cols: int):
    r, c = a.shape
    if r == rows and c == cols:
        return a
    return jnp.pad(a, ((0, rows - r), (0, cols - c)))


# NT-form contraction: contract the last dim of both operands -> straight into
# the MXU with no transposed tile copy through the XLU.
_DIMS_NT = (((1,), (1,)), ((), ()))


def _lora_kernel_fused(x_ref, w_ref, bias_ref, xa_ref, b_ref, o_ref, *,
                       scale, tn):
    """Single-K-tile kernel: grid (M tiles, N tiles). No accumulator scratch."""
    j = pl.program_id(1)
    acc = jax.lax.dot_general(x_ref[...], w_ref[...], _DIMS_NT,
                              preferred_element_type=jnp.float32)
    off = pl.multiple_of(j * tn, tn)
    b_tile = b_ref[pl.ds(off, tn), :]            # resident B, rows of tile j
    lora = jax.lax.dot_general(xa_ref[...].astype(b_tile.dtype), b_tile,
                               _DIMS_NT, preferred_element_type=jnp.float32)
    o_ref[...] = (acc + bias_ref[...].astype(jnp.float32)
                  + lora * scale).astype(o_ref.dtype)


def _lora_kernel_splitk(x_ref, w_ref, bias_ref, xa_ref, b_ref, o_ref, acc_ref,
                        *, scale, tn):
    """K-split kernel: grid (M, N, K tiles); f32 accumulator, one epilogue."""
    j = pl.program_id(1)
    k = pl.program_id(2)
    nk = pl.num_programs(2)

    @pl.when(k == 0)
    def _():
        acc_ref[...] = jnp.zeros_like(acc_ref)

    acc_ref[...] += jax.lax.dot_general(x_ref[...], w_ref[...], _DIMS_NT,
                                        preferred_element_type=jnp.float32)

    @pl.when(k == nk - 1)
    def _():
        off = pl.multiple_of(j * tn, tn)
        b_tile = b_ref[pl.ds(off, tn), :]
        lora = jax.lax.dot_general(xa_ref[...].astype(b_tile.dtype), b_tile,
                                   _DIMS_NT, preferred_element_type=jnp.float32)
        o_ref[...] = (acc_ref[...] + bias_ref[...].astype(jnp.float32)
                      + lora * scale).astype(o_ref.dtype)


def prepare_lora_params(w, bias, lora_a, lora_b, *, alpha, rank,
                        tm=512, tn=512, tk=1024,
                        vmem_budget_bytes=40 * 1024 * 1024,
                        vmem_limit_bytes=48 * 1024 * 1024):
    """Pad frozen tensors ONCE (adapter-init time) and fix the tiling.

    w:      [out_features, in_features]   (frozen original weight)
    bias:   [out_features]                (frozen original bias)
    lora_a: [rank, in_features]
    lora_b: [out_features, rank]
    """
    out_features, in_features = w.shape
    itemsize = jnp.dtype(w.dtype).itemsize

    TN = min(tn, _round_up(out_features, 128))
    R = _round_up(rank, 8)
    K128 = _round_up(in_features, 128)

    # Collapse the K axis (single reduction tile) when the footprint fits:
    # double-buffered x/W slabs + double-buffered out tile + resident B/xa.
    fused_bytes = (2 * (tm * K128 + TN * K128) * itemsize
                   + 2 * tm * TN * itemsize
                   + _round_up(out_features, TN) * R * itemsize
                   + tm * R * 4)
    TK = K128 if fused_bytes <= vmem_budget_bytes else min(tk, K128)

    K = _round_up(in_features, TK)
    N = _round_up(out_features, TN)

    return dict(
        w_p=_pad2d(w, N, K),
        bias_p=_pad2d(bias.reshape(1, out_features), 1, N),
        a_p=_pad2d(lora_a, R, K),
        b_p=_pad2d(lora_b, N, R),     # unscaled: scale applied in f32 epilogue
        scale=float(alpha) / float(rank),
        in_features=in_features, out_features=out_features,
        tm=tm, TN=TN, TK=TK, N=N, K=K, R=R,
        vmem_limit_bytes=vmem_limit_bytes,
    )


def lora_linear(x, params):
    """Fused LoRA linear forward.  x: [batch, in_features]."""
    batch, in_features = x.shape
    assert in_features == params["in_features"]
    TN, TK = params["TN"], params["TK"]
    N, K, R = params["N"], params["K"], params["R"]
    TM = min(params["tm"], _round_up(batch, 8))
    M = _round_up(batch, TM)

    x_p = _pad2d(x, M, K)

    # TODO(synk): dropout p > 0 (training mode) would apply a stochastic mask
    # to x here before the rank projection.
    # Hoisted rank projection xa = x @ A^T: tiny mem-bound matmul; keeps the
    # N grid axis parallel and avoids re-streaming A inside the kernel.
    xa = jax.lax.dot_general(x_p, params["a_p"], _DIMS_NT,
                             precision=jax.lax.Precision.HIGHEST,
                             preferred_element_type=jnp.float32)

    scale = params["scale"]
    nk = K // TK

    if nk == 1:
        kernel = functools.partial(_lora_kernel_fused, scale=scale, tn=TN)
        grid = (M // TM, N // TN)
        in_specs = [
            pl.BlockSpec((TM, K), lambda i, j: (i, 0)),    # x (full K)
            pl.BlockSpec((TN, K), lambda i, j: (j, 0)),    # W (full K)
            pl.BlockSpec((1, TN), lambda i, j: (0, j)),    # bias
            pl.BlockSpec((TM, R), lambda i, j: (i, 0)),    # xa = x @ A^T
            pl.BlockSpec((N, R), lambda i, j: (0, 0)),     # B, fully resident
        ]
        out_specs = pl.BlockSpec((TM, TN), lambda i, j: (i, j))
        scratch_shapes = []
        dim_sem = ("parallel", "parallel")
    else:
        kernel = functools.partial(_lora_kernel_splitk, scale=scale, tn=TN)
        grid = (M // TM, N // TN, nk)
        in_specs = [
            pl.BlockSpec((TM, TK), lambda i, j, k: (i, k)),
            pl.BlockSpec((TN, TK), lambda i, j, k: (j, k)),
            pl.BlockSpec((1, TN), lambda i, j, k: (0, j)),
            pl.BlockSpec((TM, R), lambda i, j, k: (i, 0)),
            pl.BlockSpec((N, R), lambda i, j, k: (0, 0)),
        ]
        out_specs = pl.BlockSpec((TM, TN), lambda i, j, k: (i, j))
        scratch_shapes = [pltpu.VMEM((TM, TN), jnp.float32)]
        dim_sem = ("parallel", "parallel", "arbitrary")

    out_p = pl.pallas_call(
        kernel,
        out_shape=jax.ShapeDtypeStruct((M, N), x.dtype),
        grid_spec=pltpu.PrefetchScalarGridSpec(
            num_scalar_prefetch=0,
            grid=grid,
            in_specs=in_specs,
            out_specs=out_specs,
            scratch_shapes=scratch_shapes,
        ),
        compiler_params=pltpu.CompilerParams(
            dimension_semantics=dim_sem,
            vmem_limit_bytes=params["vmem_limit_bytes"],
        ),
    )(x_p, params["w_p"], params["bias_p"], xa, params["b_p"])

    return out_p[:batch, :params["out_features"]]


def _reference(x, w, bias, lora_a, lora_b, *, alpha, rank):
    hi = jax.lax.Precision.HIGHEST
    orig = jnp.dot(x, w.T, precision=hi) + bias
    lora = jnp.dot(jnp.dot(x, lora_a.T, precision=hi), lora_b.T,
                   precision=hi) * (alpha / rank)
    return orig + lora


if __name__ == "__main__":
    key = jax.random.PRNGKey(0)
    kx, kw, kb, ka, kx2, kw2, kbb2, ka2, kB2 = jax.random.split(key, 9)

    # ---- Test 1: module-default init (B == 0), tiny shapes, fused-K path ---
    batch, in_features, out_features, rank, alpha = 8, 32, 32, 4, 8.0
    x = jax.random.normal(kx, (batch, in_features), dtype=jnp.float32)
    w = jax.random.normal(kw, (out_features, in_features), dtype=jnp.float32) * 0.1
    bias = jax.random.normal(kb, (out_features,), dtype=jnp.float32) * 0.1
    lora_a = jax.random.normal(ka, (rank, in_features), dtype=jnp.float32) * 0.02
    lora_b = jnp.zeros((out_features, rank), dtype=jnp.float32)

    params1 = prepare_lora_params(w, bias, lora_a, lora_b,
                                  alpha=alpha, rank=rank)
    out = jax.block_until_ready(lora_linear(x, params1))
    ref = _reference(x, w, bias, lora_a, lora_b, alpha=alpha, rank=rank)
    assert out.shape == (batch, out_features)
    assert jnp.allclose(out, ref, atol=1e-4, rtol=1e-4), "test 1 mismatch"

    # ---- Test 2: nonzero B, non-aligned shapes, forced split-K path --------
    batch2, in2, out2, rank2, alpha2 = 20, 200, 200, 8, 16.0
    x2 = jax.random.normal(kx2, (batch2, in2), dtype=jnp.float32)
    w2 = jax.random.normal(kw2, (out2, in2), dtype=jnp.float32) * 0.1
    bias2 = jax.random.normal(kbb2, (out2,), dtype=jnp.float32) * 0.1
    a2 = jax.random.normal(ka2, (rank2, in2), dtype=jnp.float32) * 0.02
    b2 = jax.random.normal(kB2, (out2, rank2), dtype=jnp.float32) * 0.1

    params2 = prepare_lora_params(w2, bias2, a2, b2, alpha=alpha2, rank=rank2,
                                  tm=8, tn=128, tk=128,
                                  vmem_budget_bytes=0)   # force K split: grid (3,2,2)
    out2_v = jax.block_until_ready(lora_linear(x2, params2))
    ref2 = _reference(x2, w2, bias2, a2, b2, alpha=alpha2, rank=rank2)
    assert out2_v.shape == (batch2, out2)
    assert jnp.allclose(out2_v, ref2, atol=1e-4, rtol=1e-4), "test 2 mismatch"

    print("KERNEL_OK")
</pallas_src>

<mosaic_0001>
module attributes {stable_mosaic.version = 11 : i64} {
  func.func @_lora_kernel_fused(%arg0: i32, %arg1: i32, %arg2: memref<8x128xf32, #tpu.memory_space<vmem>>, %arg3: memref<128x128xf32, #tpu.memory_space<vmem>>, %arg4: memref<1x128xf32, #tpu.memory_space<vmem>>, %arg5: memref<8x8xf32, #tpu.memory_space<vmem>>, %arg6: memref<128x8xf32, #tpu.memory_space<vmem>>, %arg7: memref<8x128xf32, #tpu.memory_space<vmem>>) attributes {dimension_semantics = [#tpu.dimension_semantics<parallel>, #tpu.dimension_semantics<parallel>], iteration_bounds = array<i64: 1, 1>, scalar_prefetch = 0 : i64, scratch_operands = 0 : i64, tpu.core_type = #tpu.core_type<tc>, window_params = [{transform_indices = @transform_0, window_bounds = array<i64: 8, 128>}, {transform_indices = @transform_1, window_bounds = array<i64: 128, 128>}, {transform_indices = @transform_2, window_bounds = array<i64: 1, 128>}, {transform_indices = @transform_3, window_bounds = array<i64: 8, 8>}, {pipeline_mode = #tpu.pipeline_mode<synchronous>, transform_indices = @transform_4, window_bounds = array<i64: 128, 8>}, {transform_indices = @transform_5, window_bounds = array<i64: 8, 128>}]} {
    %c0 = arith.constant 0 : index
    %c0_0 = arith.constant 0 : index
    %0 = vector.load %arg2[%c0, %c0_0] : memref<8x128xf32, #tpu.memory_space<vmem>>, vector<8x128xf32>
    %c0_1 = arith.constant 0 : index
    %c0_2 = arith.constant 0 : index
    %1 = vector.load %arg3[%c0_1, %c0_2] : memref<128x128xf32, #tpu.memory_space<vmem>>, vector<128x128xf32>
    %cst = arith.constant dense<0.000000e+00> : vector<8x128xf32>
    %2 = tpu.matmul %0, %1, %cst {dimension_numbers = #tpu.dot_dimension_numbers<[1], [1], [0], [0], [0, 0, 1, 0], [], []>} : vector<8x128xf32>, vector<128x128xf32>, vector<8x128xf32> -> vector<8x128xf32>
    %c128_i32 = arith.constant 128 : i32
    %3 = arith.muli %arg1, %c128_i32 : i32
    %4 = tpu.assume_multiple %3, 128 : i32
    %5 = arith.index_cast %4 : i32 to index
    %c0_3 = arith.constant 0 : index
    %6 = vector.load %arg6[%5, %c0_3] : memref<128x8xf32, #tpu.memory_space<vmem>>, vector<128x8xf32>
    %c0_4 = arith.constant 0 : index
    %c0_5 = arith.constant 0 : index
    %7 = vector.load %arg5[%c0_4, %c0_5] : memref<8x8xf32, #tpu.memory_space<vmem>>, vector<8x8xf32>
    %cst_6 = arith.constant dense<0.000000e+00> : vector<8x128xf32>
    %8 = tpu.matmul %7, %6, %cst_6 {dimension_numbers = #tpu.dot_dimension_numbers<[1], [1], [0], [0], [0, 0, 1, 0], [], []>} : vector<8x8xf32>, vector<128x8xf32>, vector<8x128xf32> -> vector<8x128xf32>
    %c0_7 = arith.constant 0 : index
    %c0_8 = arith.constant 0 : index
    %9 = vector.load %arg4[%c0_7, %c0_8] : memref<1x128xf32, #tpu.memory_space<vmem>>, vector<1x128xf32>
    %10 = vector.broadcast %9 : vector<1x128xf32> to vector<8x128xf32>
    %11 = arith.addf %2, %10 : vector<8x128xf32>
    %cst_9 = arith.constant 2.000000e+00 : f32
    %12 = vector.broadcast %cst_9 : f32 to vector<8x128xf32>
    %13 = arith.mulf %8, %12 : vector<8x128xf32>
    %14 = arith.addf %11, %13 : vector<8x128xf32>
    %c0_10 = arith.constant 0 : index
    %c0_11 = arith.constant 0 : index
    %15 = vector.load %arg7[%c0_10, %c0_11] : memref<8x128xf32, #tpu.memory_space<vmem>>, vector<8x128xf32>
    tpu.vector_store %arg7[%c0_10, %c0_11], %14 {strides = array<i32>} : memref<8x128xf32, #tpu.memory_space<vmem>>, vector<8x128xf32>,
    return
  }
  func.func @transform_0(%arg0: i32, %arg1: i32) -> (i32, i32) {
    %c0_i32 = arith.constant 0 : i32
    %c0_i32_0 = arith.constant 0 : i32
    return %arg0, %c0_i32 : i32, i32
  }
  func.func @transform_1(%arg0: i32, %arg1: i32) -> (i32, i32) {
    %c0_i32 = arith.constant 0 : i32
    %c0_i32_0 = arith.constant 0 : i32
    return %arg1, %c0_i32 : i32, i32
  }
  func.func @transform_2(%arg0: i32, %arg1: i32) -> (i32, i32) {
    %c0_i32 = arith.constant 0 : i32
    %c0_i32_0 = arith.constant 0 : i32
    return %c0_i32, %arg1 : i32, i32
  }
  func.func @transform_3(%arg0: i32, %arg1: i32) -> (i32, i32) {
    %c0_i32 = arith.constant 0 : i32
    %c0_i32_0 = arith.constant 0 : i32
    return %arg0, %c0_i32 : i32, i32
  }
  func.func @transform_4(%arg0: i32, %arg1: i32) -> (i32, i32) {
    %c0_i32 = arith.constant 0 : i32
    %c0_i32_0 = arith.constant 0 : i32
    %c0_i32_1 = arith.constant 0 : i32
    return %c0_i32, %c0_i32_0 : i32, i32
  }
  func.func @transform_5(%arg0: i32, %arg1: i32) -> (i32, i32) {
    %c0_i32 = arith.constant 0 : i32
    return %arg0, %arg1 : i32, i32
  }
}

</mosaic_0001>

<bundles_post_ra>
// kernel: tpu_custom_call.1
= control target key start
LH: loop header
LB: loop body
LE: loop exit
PB: predicated region body
PF: predicated region fallthrough
CT: control target
= control target key end

     0   :  { %10 = vsyncpa [#allocation3], 0  ;;  %s717_s0 = inlined_call_operand.vmem [shape: f32[8,128], index: 0, kind: input, shape index: {}]   ;;  %s718_s1 = inlined_call_operand.vmem [shape: f32[128,128], index: 1, kind: input, shape index: {}]   ;;  %s719_s2 = inlined_call_operand.vmem [shape: f32[1,128], index: 2, kind: input, shape index: {}]   ;;  %s720_s3 = inlined_call_operand.hbm [shape: f32[8,8], index: 3, kind: input, shape index: {}]   ;;  %s721_s4 = inlined_call_operand.vmem [shape: f32[128,8], index: 4, kind: input, shape index: {}]   ;;  %s722_s5 = inlined_call_operand.hbm [shape: f32[8,128], index: 5, kind: output, shape index: {}]  }
   0x1   :  { %11 = vsyncpa [#allocation4], 0  ;;  %s517_s18 = smov [#allocation2]   ;;  %s469_s22 = scalar_lea.hbm %s720_s3, 128 }
   0x2   :  { %s24_s19 = sshll.u32 %s517_s18, 4  ;;  %p470_p0 = scmp.ne.s32.totalorder %s720_s3, %s469_s22  ;;  %s25_s19 = int_to_ptr.vmem [resolvable:$true] %s24_s19 }
   0x3   :  { %p473_p1 = scmp.lt.u32.totalorder %s469_s22, %s720_s3 }
   0x5   :  { %p475_p2 = pnand %p473_p1, %p470_p0 }
   0x7   :  { %478 = shalt.err (!%p475_p2)
}
   0x8   :  { %s479_s27 = scalar_lea.vmem %s25_s19, 128  ;;  %p484_p4 = scmp.lt.s32.totalorder %s25_s19, %s25_s19 }
   0x9   :  { %p480_p3 = scmp.ne.s32.totalorder %s25_s19, %s479_s27  ;;  %p485_p5 = scmp.lt.s32.totalorder %s479_s27, %s479_s27 }
   0xb   :  { %p486_p6 = por %p485_p5, %p484_p4 }
   0xd   :  { %p487_p7 = pnand %p486_p6, %p480_p3 }
   0xf   :  { %490 = shalt.err (!%p487_p7)
}
  0x10   :  { %27 = dma.hbm_to_vmem [thread:$0]  %s720_s3, 128, %s25_s19, [#allocation3]  }
  0x11   :  { %513 = dma.done.wait [#allocation3], 128  }
  0x12   :  { %514 = vsyncadd [#allocation3], 4294967168  ;;  %v518_v0 = vmov 0.0|0.0   ;;  %vm519_vm0 = vmmov 0   ;;  %v520_v1 = vmov 0.0   ;;  %vm69_vm1 = vcmask 64512  }
  0x13   :  { %408 = vmatprep.subr.bf16.mxu0 %v518_v0  ;;  %440 = vmatprep.subr.bf16.mxu1 %v518_v0  ;;  %vm568_vm2 = vmpackc.low %vm69_vm1, %vm69_vm1  ;;  %v52_v3 = vld [vmem:[%s721_s4] sm:$0xff]  ;;  %v53_v4 = vld [vmem:[%s721_s4 + $0x8] sm:$0xff] }
  0x14   :  { %370 = vmatprep.mubr.msk.f32.mxu0 %vm519_vm0, %v520_v1  ;;  %405 = vmatprep.mubr.msk.f32.mxu1 %vm519_vm0, %v520_v1  ;;  %v34_v5 = vld [vmem:[%s718_s1] sm:$0xff]  ;;  %v409_v6 = vpack.c.bf16 %v53_v4, %v52_v3  ;;  %v35_v7 = vld [vmem:[%s718_s1 + $0x8] sm:$0xff]  ;;  %v54_v9 = vld [vmem:[%s721_s4 + $0x10] sm:$0xff] }
  0x15   :  { %v441_v8 = vpack.c.bf16 %v35_v7, %v34_v5  ;;  %v55_v10 = vld [vmem:[%s721_s4 + $0x18] sm:$0xff]  ;;  %v36_v11 = vld [vmem:[%s718_s1 + $0x10] sm:$0xff]  ;;  %v56_v15 = vld [vmem:[%s721_s4 + $0x20] sm:$0xff] }
  0x16   :  { %411 = vmatpush3.bf16.xpose.msk.msra.mxu0 %vm568_vm2, %v409_v6  ;;  %v37_v12 = vld [vmem:[%s718_s1 + $0x18] sm:$0xff]  ;;  %v413_v13 = vpack.c.bf16 %v55_v10, %v54_v9  ;;  %v57_v16 = vld [vmem:[%s721_s4 + $0x28] sm:$0xff]  ;;  %v38_v17 = vld [vmem:[%s718_s1 + $0x20] sm:$0xff] }
  0x17   :  { %442 = vmatpush3.bf16.xpose.msra.mxu1 %v441_v8  ;;  %412 = vmatprep.subr.bf16.mxu0 %v518_v0  ;;  %v444_v14 = vpack.c.bf16 %v37_v12, %v36_v11  ;;  %v39_v18 = vld [vmem:[%s718_s1 + $0x28] sm:$0xff]  ;;  %v417_v19 = vpack.c.bf16 %v57_v16, %v56_v15  ;;  %v58_v21 = vld [vmem:[%s721_s4 + $0x30] sm:$0xff]  ;;  %v59_v22 = vld [vmem:[%s721_s4 + $0x38] sm:$0xff] }
  0x18   :  { %443 = vmatprep.subr.bf16.mxu1 %v518_v0  ;;  %v447_v20 = vpack.c.bf16 %v39_v18, %v38_v17  ;;  %v40_v23 = vld [vmem:[%s718_s1 + $0x30] sm:$0xff]  ;;  %v41_v24 = vld [vmem:[%s718_s1 + $0x38] sm:$0xff]  ;;  %v421_v25 = vpack.c.bf16 %v59_v22, %v58_v21  ;;  %v60_v27 = vld [vmem:[%s721_s4 + $0x40] sm:$0xff] }
  0x19   :  { %v450_v26 = vpack.c.bf16 %v41_v24, %v40_v23  ;;  %v61_v28 = vld [vmem:[%s721_s4 + $0x48] sm:$0xff]  ;;  %v42_v29 = vld [vmem:[%s718_s1 + $0x40] sm:$0xff]  ;;  %v62_v33 = vld [vmem:[%s721_s4 + $0x50] sm:$0xff] }
  0x1a   :  { %v43_v30 = vld [vmem:[%s718_s1 + $0x48] sm:$0xff]  ;;  %v425_v31 = vpack.c.bf16 %v61_v28, %v60_v27  ;;  %v63_v34 = vld [vmem:[%s721_s4 + $0x58] sm:$0xff]  ;;  %v44_v35 = vld [vmem:[%s718_s1 + $0x50] sm:$0xff] }
  0x1b   :  { %v453_v32 = vpack.c.bf16 %v43_v30, %v42_v29  ;;  %v45_v36 = vld [vmem:[%s718_s1 + $0x58] sm:$0xff]  ;;  %v429_v37 = vpack.c.bf16 %v63_v34, %v62_v33  ;;  %v64_v39 = vld [vmem:[%s721_s4 + $0x60] sm:$0xff]  ;;  %v65_v40 = vld [vmem:[%s721_s4 + $0x68] sm:$0xff] }
  0x1c   :  { %v456_v38 = vpack.c.bf16 %v45_v36, %v44_v35  ;;  %v46_v41 = vld [vmem:[%s718_s1 + $0x60] sm:$0xff]  ;;  %v47_v42 = vld [vmem:[%s718_s1 + $0x68] sm:$0xff]  ;;  %v433_v43 = vpack.c.bf16 %v65_v40, %v64_v39  ;;  %v66_v45 = vld [vmem:[%s721_s4 + $0x70] sm:$0xff] }
  0x1d   :  { %v459_v44 = vpack.c.bf16 %v47_v42, %v46_v41  ;;  %v67_v46 = vld [vmem:[%s721_s4 + $0x78] sm:$0xff]  ;;  %v48_v47 = vld [vmem:[%s718_s1 + $0x70] sm:$0xff]  ;;  %v68_v51 = vld [vmem:[#allocation2] sm:$0xff] }
  0x1e   :  { %415 = vmatpush3.bf16.xpose.msk.msra.mxu0 %vm568_vm2, %v413_v13  ;;  %v49_v48 = vld [vmem:[%s718_s1 + $0x78] sm:$0xff]  ;;  %v437_v49 = vpack.c.bf16 %v67_v46, %v66_v45  ;;  %v33_v52 = vld [vmem:[%s717_s0] sm:$0xff]  ;;  %s521_s1 = smov [#allocation5]  }
  0x1f   :  { %445 = vmatpush3.bf16.xpose.msra.mxu1 %v444_v14  ;;  %416 = vmatprep.subr.bf16.mxu0 %v518_v0  ;;  %v462_v50 = vpack.c.bf16 %v49_v48, %v48_v47  ;;  %v303_v53 = vld [vmem:[%s719_s2] ss:$0 sm:$0xff]  ;;  %s277_s19 = sshll.u32 %s521_s1, 4  ;;  %s278_s19 = int_to_ptr.vmem [resolvable:$true] %s277_s19 }
  0x20   :  { %446 = vmatprep.subr.bf16.mxu1 %v518_v0  ;;  %s491_s20 = scalar_lea.vmem %s278_s19, 128  ;;  %p496_p9 = scmp.lt.s32.totalorder %s278_s19, %s278_s19 }
  0x21   :  { %p492_p8 = scmp.ne.s32.totalorder %s278_s19, %s491_s20  ;;  %p497_p10 = scmp.lt.s32.totalorder %s491_s20, %s491_s20 }
  0x23   :  { %p498_p11 = por %p497_p10, %p496_p9 }
  0x25   :  { %p499_p12 = pnand %p498_p11, %p492_p8 }
  0x26   :  { %419 = vmatpush3.bf16.xpose.msk.msra.mxu0 %vm568_vm2, %v417_v19 }
  0x27   :  { %448 = vmatpush3.bf16.xpose.msra.mxu1 %v447_v20  ;;  %420 = vmatprep.subr.bf16.mxu0 %v518_v0 }
  0x28   :  { %449 = vmatprep.subr.bf16.mxu1 %v518_v0 }
  0x2e   :  { %423 = vmatpush3.bf16.xpose.msk.msra.mxu0 %vm568_vm2, %v421_v25 }
  0x2f   :  { %451 = vmatpush3.bf16.xpose.msra.mxu1 %v450_v26  ;;  %424 = vmatprep.subr.bf16.mxu0 %v518_v0 }
  0x30   :  { %452 = vmatprep.subr.bf16.mxu1 %v518_v0 }
  0x36   :  { %427 = vmatpush3.bf16.xpose.msk.msra.mxu0 %vm568_vm2, %v425_v31 }
  0x37   :  { %454 = vmatpush3.bf16.xpose.msra.mxu1 %v453_v32  ;;  %428 = vmatprep.subr.bf16.mxu0 %v518_v0 }
  0x38   :  { %455 = vmatprep.subr.bf16.mxu1 %v518_v0 }
  0x3e   :  { %431 = vmatpush3.bf16.xpose.msk.msra.mxu0 %vm568_vm2, %v429_v37 }
  0x3f   :  { %457 = vmatpush3.bf16.xpose.msra.mxu1 %v456_v38  ;;  %432 = vmatprep.subr.bf16.mxu0 %v518_v0 }
  0x40   :  { %458 = vmatprep.subr.bf16.mxu1 %v518_v0 }
  0x46   :  { %435 = vmatpush3.bf16.xpose.msk.msra.mxu0 %vm568_vm2, %v433_v43 }
  0x47   :  { %460 = vmatpush3.bf16.xpose.msra.mxu1 %v459_v44  ;;  %436 = vmatprep.subr.bf16.mxu0 %v518_v0 }
  0x48   :  { %461 = vmatprep.subr.bf16.mxu1 %v518_v0 }
  0x4e   :  { %439 = vmatpush3.bf16.xpose.msk.msra.mxu0 %vm568_vm2, %v437_v49 }
  0x4f   :  { %463 = vmatpush3.bf16.xpose.msra.mxu1 %v462_v50 }
  0x55   :  { %371 = vmatmul.mubr.msk.f32.vlgmr.msra.gmra.mrb[0].mxu0 %vm69_vm1, %v68_v51 }
  0x56   :  { %406 = vmatmul.mubr.f32.vlgmr.msra.gmra.mrb[0].mxu1 %v33_v52 }
 0x128   :  { %v187_v54 = vpop.f32.mrb[0].mxu0 }
 0x129   :  { %v268_v55 = vmul.f32 2.0, %v187_v54  ;;  %v264_v56 = vpop.f32.mrb[0].mxu1  ;;  %v372_v57 = vpop.f32.mrb[1].mxu0 }
 0x12a   :  { %v265_v58 = vadd.f32 %v303_v53, %v264_v56  ;;  %v407_v59 = vpop.f32.mrb[1].mxu1 }
 0x12c   :  { %v269_v60 = vadd.f32 %v268_v55, %v265_v58 }
 0x12e   :  { %270 = vst [vmem:[#allocation5] sm:$0xff] %v269_v60 }
 0x12f   :  { %502 = shalt.err (!%p499_p12)
}
 0x130   :  { %s503_s21 = scalar_lea.hbm %s722_s5, 128 }
 0x131   :  { %p504_p13 = scmp.ne.s32.totalorder %s722_s5, %s503_s21  ;;  %p507_p0 = scmp.lt.u32.totalorder %s503_s21, %s722_s5 }
 0x133   :  { %p509_p1 = pnand %p507_p0, %p504_p13 }
 0x135   :  { %512 = shalt.err (!%p509_p1)
}
 0x136   :  { %280 = dma.vmem_to_hbm [thread:$0]  %s278_s19, 128, %s722_s5, [#allocation4]  }
 0x137   :  { %515 = dma.done.wait [#allocation4], 128  }
 0x138   :  { %516 = vsyncadd [#allocation4], 4294967168 }
 0x139   :  { %284 = vsyncpa [#allocation3], 1 }
 0x13a   :  { %285 = vsyncpa [#allocation4], 1 }

</bundles_post_ra>
